<compile_context>
chip_gen: v7x
topology: tpu7x:2x2x1
jax: 0.10.0
libtpu: 0.0.40
codegen_flags: <defaults>
</compile_context>

<pallas_src>
import functools
import math

import jax
import jax.numpy as jnp
from jax.experimental import pallas as pl
from jax.experimental.pallas import tpu as pltpu


def _round_up(x, m):
    return ((x + m - 1) // m) * m


def _hinge_kernel(real_ref, fake_ref, w_ref, b_ref, out_ref,
                  acc_real, acc_fake, *, n_rows, tb):
    """Grid = (B tiles, F tiles); F is the reduction axis (last, arbitrary)."""
    k = pl.program_id(1)
    last_k = pl.num_programs(1) - 1
    # Hoisted: grid-index primitives must not appear inside pl.when closures
    # (cond branch jaxprs do not get the grid-index substitution on the
    # interpreter/fallback path). Cheap (TB,1) int work per step.
    row_ids = (pl.program_id(0) * tb
               + jax.lax.broadcasted_iota(jnp.int32, (tb, 1), 0))

    @pl.when(k == 0)
    def _init():
        acc_real[...] = jnp.zeros_like(acc_real)
        acc_fake[...] = jnp.zeros_like(acc_fake)

    # Per-tile cast to f32 (inputs may be bf16 in HBM); VPU mul + XLU lane
    # reduce instead of a 1-column MXU matvec. w tile is shared by both
    # streams (its BlockSpec only depends on the F grid index).
    w_row = w_ref[...].astype(jnp.float32)                          # (1, TF)
    acc_real[...] += jnp.sum(real_ref[...].astype(jnp.float32) * w_row,
                             axis=-1, keepdims=True)                # (TB, 1)
    acc_fake[...] += jnp.sum(fake_ref[...].astype(jnp.float32) * w_row,
                             axis=-1, keepdims=True)

    @pl.when(k == last_k)
    def _finalize():
        b = b_ref[0, 0]
        # Bias folded into the hinge thresholds:
        #   relu(1 - (s_r + b)) = relu((1 - b) - s_r)
        #   relu(1 + (s_f + b)) = relu((1 + b) + s_f)
        h = (jnp.maximum((1.0 - b) - acc_real[...], 0.0) +
             jnp.maximum((1.0 + b) + acc_fake[...], 0.0))           # (TB, 1)
        # Zero out rows that are batch padding.
        out_ref[...] = jnp.where(row_ids < n_rows, h, 0.0)


def hinge_loss_gan(fake, real, w, b, *, tb=512, tf=2048):
    """fake, real: [B, C, H, W] (f32 or bf16); w: [C*H*W, 1]; b: scalar.

    Returns the scalar f32 hinge discriminator loss.
    """
    assert fake.shape == real.shape
    B = fake.shape[0]
    F = math.prod(fake.shape[1:])

    # Row-major flatten, same as torch .view(B, -1). No host-side f32 cast:
    # the cast happens per tile inside the kernel.
    fake2d = fake.reshape(B, F)
    real2d = real.reshape(B, F)
    w_row = w.astype(jnp.float32).reshape(1, F)
    b2d = jnp.asarray(b, jnp.float32).reshape(1, 1)

    # Tile sizes: multiples of (8, 128), capped at the (padded) array extents.
    TB = min(tb, _round_up(B, 8))
    TF = min(tf, _round_up(F, 128))
    B_pad = _round_up(B, TB)
    F_pad = _round_up(F, TF)

    if (B_pad, F_pad) != (B, F):
        pad = ((0, B_pad - B), (0, F_pad - F))
        fake2d = jnp.pad(fake2d, pad)
        real2d = jnp.pad(real2d, pad)
        w_row = jnp.pad(w_row, ((0, 0), (0, F_pad - F)))

    grid = (B_pad // TB, F_pad // TF)
    in_bytes = fake2d.dtype.itemsize

    kernel = functools.partial(_hinge_kernel, n_rows=B, tb=TB)

    partial_rows = pl.pallas_call(
        kernel,
        out_shape=jax.ShapeDtypeStruct((B_pad, 1), jnp.float32),
        grid_spec=pltpu.PrefetchScalarGridSpec(
            num_scalar_prefetch=0,
            grid=grid,
            in_specs=[
                pl.BlockSpec((TB, TF), lambda i, k: (i, k)),          # real
                pl.BlockSpec((TB, TF), lambda i, k: (i, k)),          # fake
                pl.BlockSpec((1, TF), lambda i, k: (0, k)),           # w
                pl.BlockSpec(memory_space=pltpu.MemorySpace.SMEM),    # bias
            ],
            out_specs=pl.BlockSpec((TB, 1), lambda i, k: (i, 0)),
            scratch_shapes=[pltpu.VMEM((TB, 1), jnp.float32),
                            pltpu.VMEM((TB, 1), jnp.float32)],
        ),
        compiler_params=pltpu.CompilerParams(
            dimension_semantics=("parallel", "arbitrary"),
            vmem_limit_bytes=48 * 1024 * 1024,
        ),
        cost_estimate=pl.CostEstimate(
            flops=4 * B_pad * F_pad,
            transcendentals=0,
            bytes_accessed=2 * B_pad * F_pad * in_bytes + 4 * F_pad + 4 * B_pad,
        ),
    )(real2d, fake2d, w_row, b2d)

    # Mean over the batch done once at the end (sum of per-row hinge terms / B).
    return jnp.sum(partial_rows) * (1.0 / B)


def hinge_loss_gan_ref(fake, real, w, b):
    """Pure-JAX reference mirroring the PyTorch forward (f32 math)."""
    B = fake.shape[0]
    w_row = w.astype(jnp.float32).reshape(1, -1)
    s_real = jnp.sum(real.reshape(B, -1).astype(jnp.float32) * w_row, axis=-1) + b
    s_fake = jnp.sum(fake.reshape(B, -1).astype(jnp.float32) * w_row, axis=-1) + b
    return (jnp.mean(jax.nn.relu(1.0 - s_real)) +
            jnp.mean(jax.nn.relu(1.0 + s_fake)))


if __name__ == "__main__":
    key = jax.random.PRNGKey(0)
    k_fake, k_real, k_w, k2_fake, k2_real = jax.random.split(key, 5)

    # Small shape consistent with the module: NCHW [2, 4, 16, 16].
    B, C, H, W = 2, 4, 16, 16
    F = C * H * W
    fake = jax.random.normal(k_fake, (B, C, H, W), dtype=jnp.float32)
    real = jax.random.normal(k_real, (B, C, H, W), dtype=jnp.float32)
    w = jax.random.normal(k_w, (F, 1), dtype=jnp.float32) / jnp.sqrt(F)
    b = jnp.float32(0.1)

    loss = jax.block_until_ready(hinge_loss_gan(fake, real, w, b))
    ref = jax.block_until_ready(hinge_loss_gan_ref(fake, real, w, b))
    assert jnp.allclose(loss, ref, rtol=1e-5, atol=1e-5), (loss, ref)

    # Second check: bf16 inputs, ragged batch (row masking) and a multi-tile
    # F reduction (F=4096 with TF=2048 -> two reduction steps).
    B2, C2, H2, W2 = 18, 4, 32, 32
    F2 = C2 * H2 * W2
    fake2 = jax.random.normal(k2_fake, (B2, C2, H2, W2), dtype=jnp.bfloat16)
    real2 = jax.random.normal(k2_real, (B2, C2, H2, W2), dtype=jnp.bfloat16)
    w2 = jax.random.normal(k_w, (F2, 1), dtype=jnp.float32) / jnp.sqrt(F2)
    loss2 = jax.block_until_ready(hinge_loss_gan(fake2, real2, w2, b))
    ref2 = jax.block_until_ready(hinge_loss_gan_ref(fake2, real2, w2, b))
    assert jnp.allclose(loss2, ref2, rtol=1e-4, atol=1e-4), (loss2, ref2)

    print("KERNEL_OK")
</pallas_src>

<mosaic_0001>
module attributes {stable_mosaic.version = 11 : i64} {
  func.func @_hinge_kernel(%arg0: i32, %arg1: i32, %arg2: memref<8x1024xf32, #tpu.memory_space<vmem>>, %arg3: memref<8x1024xf32, #tpu.memory_space<vmem>>, %arg4: memref<1x1024xf32, #tpu.memory_space<vmem>>, %arg5: memref<1x1xf32, #tpu.memory_space<smem>>, %arg6: memref<8x1xf32, #tpu.memory_space<vmem>>, %arg7: memref<8x1xf32, #tpu.memory_space<vmem>>, %arg8: memref<8x1xf32, #tpu.memory_space<vmem>>) attributes {dimension_semantics = [#tpu.dimension_semantics<parallel>, #tpu.dimension_semantics<arbitrary>], iteration_bounds = array<i64: 1, 1>, scalar_prefetch = 0 : i64, scratch_operands = 2 : i64, tpu.core_type = #tpu.core_type<tc>, window_params = [{transform_indices = @transform_0, window_bounds = array<i64: 8, 1024>}, {transform_indices = @transform_1, window_bounds = array<i64: 8, 1024>}, {transform_indices = @transform_2, window_bounds = array<i64: 1, 1024>}, {transform_indices = @transform_3, window_bounds = array<i64: 1, 1>}, {transform_indices = @transform_4, window_bounds = array<i64: 8, 1>}]} {
    %c8_i32 = arith.constant 8 : i32
    %0 = arith.muli %arg0, %c8_i32 : i32
    %1 = tpu.iota {dimensions = array<i32: 0>} : vector<8x1xi32>
    %2 = vector.broadcast %0 : i32 to vector<8x1xi32>
    %3 = arith.addi %2, %1 : vector<8x1xi32>
    %c0_i32 = arith.constant 0 : i32
    %4 = arith.cmpi eq, %arg1, %c0_i32 : i32
    %5 = arith.extui %4 : i1 to i32
    %c0_i32_0 = arith.constant 0 : i32
    %6 = arith.cmpi ne, %5, %c0_i32_0 : i32
    scf.if %6 {
      %cst_17 = arith.constant 0.000000e+00 : f32
      %27 = vector.broadcast %cst_17 : f32 to vector<8x1xf32>
      %c0_18 = arith.constant 0 : index
      %c0_19 = arith.constant 0 : index
      %28 = vector.load %arg7[%c0_18, %c0_19] : memref<8x1xf32, #tpu.memory_space<vmem>>, vector<8x1xf32>
      tpu.vector_store %arg7[%c0_18, %c0_19], %27 {strides = array<i32>} : memref<8x1xf32, #tpu.memory_space<vmem>>, vector<8x1xf32>,
      %cst_20 = arith.constant 0.000000e+00 : f32
      %29 = vector.broadcast %cst_20 : f32 to vector<8x1xf32>
      %c0_21 = arith.constant 0 : index
      %c0_22 = arith.constant 0 : index
      %30 = vector.load %arg8[%c0_21, %c0_22] : memref<8x1xf32, #tpu.memory_space<vmem>>, vector<8x1xf32>
      tpu.vector_store %arg8[%c0_21, %c0_22], %29 {strides = array<i32>} : memref<8x1xf32, #tpu.memory_space<vmem>>, vector<8x1xf32>,
    } else {
    }
    %c0 = arith.constant 0 : index
    %c0_1 = arith.constant 0 : index
    %7 = vector.load %arg4[%c0, %c0_1] : memref<1x1024xf32, #tpu.memory_space<vmem>>, vector<1x1024xf32>
    %c0_2 = arith.constant 0 : index
    %c0_3 = arith.constant 0 : index
    %8 = vector.load %arg7[%c0_2, %c0_3] : memref<8x1xf32, #tpu.memory_space<vmem>>, vector<8x1xf32>
    %c0_4 = arith.constant 0 : index
    %c0_5 = arith.constant 0 : index
    %9 = vector.load %arg2[%c0_4, %c0_5] : memref<8x1024xf32, #tpu.memory_space<vmem>>, vector<8x1024xf32>
    %10 = vector.broadcast %7 : vector<1x1024xf32> to vector<8x1024xf32>
    %11 = arith.mulf %9, %10 : vector<8x1024xf32>
    %cst = arith.constant dense<0.000000e+00> : vector<8xf32>
    %12 = vector.multi_reduction <add>, %11, %cst [1] : vector<8x1024xf32> to vector<8xf32>
    %13 = vector.shape_cast %12 : vector<8xf32> to vector<8x1xf32>
    %14 = arith.addf %8, %13 : vector<8x1xf32>
    %c0_6 = arith.constant 0 : index
    %c0_7 = arith.constant 0 : index
    %15 = vector.load %arg7[%c0_6, %c0_7] : memref<8x1xf32, #tpu.memory_space<vmem>>, vector<8x1xf32>
    tpu.vector_store %arg7[%c0_6, %c0_7], %14 {strides = array<i32>} : memref<8x1xf32, #tpu.memory_space<vmem>>, vector<8x1xf32>,
    %c0_8 = arith.constant 0 : index
    %c0_9 = arith.constant 0 : index
    %16 = vector.load %arg8[%c0_8, %c0_9] : memref<8x1xf32, #tpu.memory_space<vmem>>, vector<8x1xf32>
    %c0_10 = arith.constant 0 : index
    %c0_11 = arith.constant 0 : index
    %17 = vector.load %arg3[%c0_10, %c0_11] : memref<8x1024xf32, #tpu.memory_space<vmem>>, vector<8x1024xf32>
    %18 = vector.broadcast %7 : vector<1x1024xf32> to vector<8x1024xf32>
    %19 = arith.mulf %17, %18 : vector<8x1024xf32>
    %cst_12 = arith.constant dense<0.000000e+00> : vector<8xf32>
    %20 = vector.multi_reduction <add>, %19, %cst_12 [1] : vector<8x1024xf32> to vector<8xf32>
    %21 = vector.shape_cast %20 : vector<8xf32> to vector<8x1xf32>
    %22 = arith.addf %16, %21 : vector<8x1xf32>
    %c0_13 = arith.constant 0 : index
    %c0_14 = arith.constant 0 : index
    %23 = vector.load %arg8[%c0_13, %c0_14] : memref<8x1xf32, #tpu.memory_space<vmem>>, vector<8x1xf32>
    tpu.vector_store %arg8[%c0_13, %c0_14], %22 {strides = array<i32>} : memref<8x1xf32, #tpu.memory_space<vmem>>, vector<8x1xf32>,
    %c0_i32_15 = arith.constant 0 : i32
    %24 = arith.cmpi eq, %arg1, %c0_i32_15 : i32
    %25 = arith.extui %24 : i1 to i32
    %c0_i32_16 = arith.constant 0 : i32
    %26 = arith.cmpi ne, %25, %c0_i32_16 : i32
    scf.if %26 {
      %c0_17 = arith.constant 0 : index
      %c0_18 = arith.constant 0 : index
      %27 = memref.load %arg5[%c0_17, %c0_18] : memref<1x1xf32, #tpu.memory_space<smem>>
      %cst_19 = arith.constant 1.000000e+00 : f32
      %28 = arith.subf %cst_19, %27 : f32
      %c0_20 = arith.constant 0 : index
      %c0_21 = arith.constant 0 : index
      %29 = vector.load %arg7[%c0_20, %c0_21] : memref<8x1xf32, #tpu.memory_space<vmem>>, vector<8x1xf32>
      %30 = vector.broadcast %28 : f32 to vector<8x1xf32>
      %31 = arith.subf %30, %29 : vector<8x1xf32>
      %cst_22 = arith.constant 0.000000e+00 : f32
      %32 = vector.broadcast %cst_22 : f32 to vector<8x1xf32>
      %33 = arith.maximumf %31, %32 : vector<8x1xf32>
      %cst_23 = arith.constant 1.000000e+00 : f32
      %34 = arith.addf %cst_23, %27 : f32
      %c0_24 = arith.constant 0 : index
      %c0_25 = arith.constant 0 : index
      %35 = vector.load %arg8[%c0_24, %c0_25] : memref<8x1xf32, #tpu.memory_space<vmem>>, vector<8x1xf32>
      %36 = vector.broadcast %34 : f32 to vector<8x1xf32>
      %37 = arith.addf %36, %35 : vector<8x1xf32>
      %cst_26 = arith.constant 0.000000e+00 : f32
      %38 = vector.broadcast %cst_26 : f32 to vector<8x1xf32>
      %39 = arith.maximumf %37, %38 : vector<8x1xf32>
      %40 = arith.addf %33, %39 : vector<8x1xf32>
      %c2_i32 = arith.constant 2 : i32
      %41 = vector.broadcast %c2_i32 : i32 to vector<8x1xi32>
      %42 = arith.cmpi slt, %3, %41 : vector<8x1xi32>
      %cst_27 = arith.constant 0.000000e+00 : f32
      %43 = vector.broadcast %cst_27 : f32 to vector<8x1xf32>
      %44 = arith.select %42, %40, %43 : vector<8x1xi1>, vector<8x1xf32>
      %c0_28 = arith.constant 0 : index
      %c0_29 = arith.constant 0 : index
      %45 = vector.load %arg6[%c0_28, %c0_29] : memref<8x1xf32, #tpu.memory_space<vmem>>, vector<8x1xf32>
      tpu.vector_store %arg6[%c0_28, %c0_29], %44 {strides = array<i32>} : memref<8x1xf32, #tpu.memory_space<vmem>>, vector<8x1xf32>,
    } else {
    }
    return
  }
  func.func @transform_0(%arg0: i32, %arg1: i32) -> (i32, i32) {
    %c0_i32 = arith.constant 0 : i32
    return %arg0, %arg1 : i32, i32
  }
  func.func @transform_1(%arg0: i32, %arg1: i32) -> (i32, i32) {
    %c0_i32 = arith.constant 0 : i32
    return %arg0, %arg1 : i32, i32
  }
  func.func @transform_2(%arg0: i32, %arg1: i32) -> (i32, i32) {
    %c0_i32 = arith.constant 0 : i32
    %c0_i32_0 = arith.constant 0 : i32
    return %c0_i32, %arg1 : i32, i32
  }
  func.func @transform_3(%arg0: i32, %arg1: i32) -> (i32, i32) {
    %c0_i32 = arith.constant 0 : i32
    %c0_i32_0 = arith.constant 0 : i32
    %c0_i32_1 = arith.constant 0 : i32
    return %c0_i32, %c0_i32_0 : i32, i32
  }
  func.func @transform_4(%arg0: i32, %arg1: i32) -> (i32, i32) {
    %c0_i32 = arith.constant 0 : i32
    %c0_i32_0 = arith.constant 0 : i32
    return %arg0, %c0_i32 : i32, i32
  }
}

</mosaic_0001>

<bundles_post_ra>
// kernel: tpu_custom_call.1
= control target key start
LH: loop header
LB: loop body
LE: loop exit
PB: predicated region body
PF: predicated region fallthrough
CT: control target
= control target key end

     0   :  { %10 = vsyncpa [#allocation6], 0  ;;  %s308_s0 = inlined_call_operand.hbm [shape: f32[8,1024], index: 0, kind: input, shape index: {}]   ;;  %s309_s1 = inlined_call_operand.hbm [shape: f32[8,1024], index: 1, kind: input, shape index: {}]   ;;  %s310_s2 = inlined_call_operand.vmem [shape: f32[1,1024], index: 2, kind: input, shape index: {}]   ;;  %s311_s3 = inlined_call_operand.<no memory space> [shape: f32[1,1], index: 3, kind: input, shape index: {}]   ;;  %s312_s4 = inlined_call_operand.vmem [shape: f32[8,1], index: 4, kind: output, shape index: {}]  }
   0x1   :  { %11 = vsyncpa [#allocation8], 0  ;;  %s228_s15 = smov [#allocation5]   ;;  %s229_s17 = smov [#allocation7]  }
   0x2   :  { %s18_s16 = sshll.u32 %s228_s15, 4  ;;  %s28_s18 = sshll.u32 %s229_s17, 4  ;;  %s19_s16 = int_to_ptr.vmem [resolvable:$true] %s18_s16  ;;  %s29_s18 = int_to_ptr.vmem [resolvable:$true] %s28_s18 }
   0x3   :  { %s180_s21 = scalar_lea.hbm %s308_s0, 1024 }
   0x4   :  { %p181_p0 = scmp.ne.s32.totalorder %s308_s0, %s180_s21  ;;  %p184_p1 = scmp.lt.u32.totalorder %s180_s21, %s308_s0 }
   0x6   :  { %p186_p2 = pnand %p184_p1, %p181_p0 }
   0x8   :  { %189 = shalt.err (!%p186_p2)
}
   0x9   :  { %s190_s26 = scalar_lea.vmem %s19_s16, 1024  ;;  %p195_p4 = scmp.lt.s32.totalorder %s19_s16, %s19_s16 }
   0xa   :  { %p191_p3 = scmp.ne.s32.totalorder %s19_s16, %s190_s26  ;;  %p196_p5 = scmp.lt.s32.totalorder %s190_s26, %s190_s26 }
   0xc   :  { %p197_p6 = por %p196_p5, %p195_p4 }
   0xe   :  { %p198_p7 = pnand %p197_p6, %p191_p3 }
  0x10   :  { %201 = shalt.err (!%p198_p7)
}
  0x11   :  { %21 = dma.hbm_to_vmem [thread:$0]  %s308_s0, 1024, %s19_s16, [#allocation6]  }
  0x12   :  { %s202_s5 = scalar_lea.hbm %s309_s1, 1024 }
  0x13   :  { %p203_p8 = scmp.ne.s32.totalorder %s309_s1, %s202_s5  ;;  %p206_p9 = scmp.lt.u32.totalorder %s202_s5, %s309_s1 }
  0x15   :  { %p208_p10 = pnand %p206_p9, %p203_p8 }
  0x17   :  { %211 = shalt.err (!%p208_p10)
}
  0x18   :  { %s212_s10 = scalar_lea.vmem %s29_s18, 1024  ;;  %p217_p12 = scmp.lt.s32.totalorder %s29_s18, %s29_s18 }
  0x19   :  { %p213_p11 = scmp.ne.s32.totalorder %s29_s18, %s212_s10  ;;  %p218_p13 = scmp.lt.s32.totalorder %s212_s10, %s212_s10 }
  0x1b   :  { %p219_p0 = por %p218_p13, %p217_p12 }
  0x1d   :  { %p220_p1 = pnand %p219_p0, %p213_p11 }
  0x1f   :  { %223 = shalt.err (!%p220_p1)
}
  0x20   :  { %31 = dma.hbm_to_vmem [thread:$0]  %s309_s1, 1024, %s29_s18, [#allocation8]  }
  0x21   :  { %224 = dma.done.wait [#allocation6], 1024  }
  0x22   :  { %225 = vsyncadd [#allocation6], 4294966272 }
  0x23   :  { %226 = dma.done.wait [#allocation8], 1024  }
  0x24   :  { %227 = vsyncadd [#allocation8], 4294966272  ;;  %v43_v0 = vlaneseq  ;;  %vm51_vm0 = vcmask 7168   ;;  %v230_v1 = vmov 0.0   ;;  %v54_v8 = vld [vmem:[%s310_s2] sm:$0xff]  ;;  %v56_v9 = vld [vmem:[#allocation5] sm:$0xff] }
  0x25   :  { %52 = vst.msk [vmem:[#allocation2] sm:$0xff] %vm51_vm0, %v230_v1  ;;  %53 = vst.msk [vmem:[#allocation3] sm:$0xff] %vm51_vm0, %v230_v1  ;;  %v57_v10 = vld [vmem:[#allocation5 + $0x8] sm:$0xff]  ;;  %v58_v12 = vld [vmem:[#allocation5 + $0x10] sm:$0xff]  ;;  %s157_s14 = ssub.f32 1.0, %s311_s3 }
  0x26   :  { %v282_v2 = vshrl.u32 %v43_v0, 7  ;;  %v59_v13 = vld [vmem:[#allocation5 + $0x18] sm:$0xff]  ;;  %v126_v23 = vld [vmem:[#allocation7] sm:$0xff]  ;;  %v127_v24 = vld [vmem:[#allocation7 + $0x8] sm:$0xff]  ;;  %s162_s17 = sadd.f32 1.0, %s311_s3 }
  0x27   :  { %v128_v25 = vld [vmem:[#allocation7 + $0x10] sm:$0xff]  ;;  %v60_v26 = vld [vmem:[#allocation5 + $0x20] sm:$0xff]  ;;  %v129_v30 = vld [vmem:[#allocation7 + $0x18] sm:$0xff] }
  0x28   :  { %v67_v3 = vsub.s32 0, %v282_v2  ;;  %v71_v4 = vsub.s32 1, %v282_v2  ;;  %v75_v5 = vsub.s32 2, %v282_v2  ;;  %v79_v6 = vsub.s32 3, %v282_v2  ;;  %v61_v35 = vld [vmem:[#allocation5 + $0x28] sm:$0xff]  ;;  %v130_v37 = vld [vmem:[#allocation7 + $0x20] sm:$0xff] }
  0x29   :  { %v83_v7 = vsub.s32 4, %v282_v2  ;;  %v87_v11 = vsub.s32 5, %v282_v2  ;;  %v91_v18 = vsub.s32 6, %v282_v2  ;;  %v95_v28 = vsub.s32 7, %v282_v2  ;;  %v62_v42 = vld [vmem:[#allocation5 + $0x30] sm:$0xff]  ;;  %v131_v44 = vld [vmem:[#allocation7 + $0x28] sm:$0xff] }
  0x2a   :  { %v68_v14 = vrot.slane %v54_v8, %v67_v3  ;;  %v72_v15 = vrot.slane %v54_v8, %v71_v4  ;;  %v76_v16 = vrot.slane %v54_v8, %v75_v5  ;;  %v80_v17 = vrot.slane %v54_v8, %v79_v6  ;;  %v63_v49 = vld [vmem:[#allocation5 + $0x38] sm:$0xff]  ;;  %v132_v50 = vld [vmem:[#allocation7 + $0x30] sm:$0xff] }
  0x2b   :  { %v84_v19 = vrot.slane %v54_v8, %v83_v7  ;;  %v88_v27 = vrot.slane %v54_v8, %v87_v11  ;;  %v92_v36 = vrot.slane %v54_v8, %v91_v18  ;;  %v96_v43 = vrot.slane %v54_v8, %v95_v28  ;;  %v133_v55 = vld [vmem:[#allocation7 + $0x38] sm:$0xff] }
  0x2c   :  { %v105_v20 = vmul.f32 %v68_v14, %v56_v9  ;;  %v106_v21 = vmul.f32 %v72_v15, %v57_v10  ;;  %v107_v22 = vmul.f32 %v76_v16, %v58_v12  ;;  %v108_v29 = vmul.f32 %v80_v17, %v59_v13  ;;  %v55_v3 = vld [vmem:[#allocation2] sm:$0xff]  ;;  %v125_v6 = vld [vmem:[#allocation3] sm:$0xff] }
  0x2d   :  { %v134_v32 = vmul.f32 %v126_v23, %v68_v14  ;;  %v135_v33 = vmul.f32 %v127_v24, %v72_v15  ;;  %v136_v34 = vmul.f32 %v128_v25, %v76_v16  ;;  %v109_v38 = vmul.f32 %v84_v19, %v60_v26 }
  0x2e   :  { %v113_v31 = vadd.f32 %v106_v21, %v105_v20  ;;  %v137_v40 = vmul.f32 %v129_v30, %v80_v17  ;;  %v110_v45 = vmul.f32 %v88_v27, %v61_v35  ;;  %v138_v47 = vmul.f32 %v130_v37, %v84_v19 }
  0x2f   :  { %v142_v41 = vadd.f32 %v135_v33, %v134_v32  ;;  %v111_v51 = vmul.f32 %v92_v36, %v62_v42  ;;  %v139_v53 = vmul.f32 %v131_v44, %v88_v27  ;;  %v112_v56 = vmul.f32 %v96_v43, %v63_v49 }
  0x30   :  { %v114_v39 = vadd.f32 %v113_v31, %v107_v22  ;;  %v140_v58 = vmul.f32 %v132_v50, %v92_v36  ;;  %v141_v61 = vmul.f32 %v133_v55, %v96_v43  ;;  %v159_v9 = vstv %s157_s14 }
  0x31   :  { %v143_v48 = vadd.f32 %v142_v41, %v136_v34  ;;  %v164_v11 = vstv %s162_s17  ;;  %vm168_vm1 = vcmp.lt.s32.totalorder %v282_v2, 2 }
  0x32   :  { %v115_v46 = vadd.f32 %v114_v39, %v108_v29 }
  0x33   :  { %v144_v54 = vadd.f32 %v143_v48, %v137_v40 }
  0x34   :  { %v116_v52 = vadd.f32 %v115_v46, %v109_v38 }
  0x35   :  { %v145_v59 = vadd.f32 %v144_v54, %v138_v47 }
  0x36   :  { %v117_v57 = vadd.f32 %v116_v52, %v110_v45 }
  0x37   :  { %v146_v62 = vadd.f32 %v145_v59, %v139_v53 }
  0x38   :  { %v118_v60 = vadd.f32 %v117_v57, %v111_v51 }
  0x39   :  { %v147_v0 = vadd.f32 %v146_v62, %v140_v58 }
  0x3a   :  { %v119_v63 = vadd.f32 %v118_v60, %v112_v56 }
  0x3b   :  { %v148_v1 = vadd.f32 %v147_v0, %v141_v61 }
  0x3c   :  { %120 = vadd.xlane.f32.xlu0 %v119_v63 }
  0x40   :  { %149 = vadd.xlane.f32.xlu0 %v148_v1 }
  0xc9   :  { %v121_v4 = vpop.xlane.xlu0 %120 }
  0xca   :  { %v122_v5 = vadd.f32 %v121_v4, %v55_v3 }
  0xcc   :  { %124 = vst.msk [vmem:[#allocation2] sm:$0xff] %vm51_vm0, %v122_v5 }
  0xcd   :  { %v150_v7 = vpop.xlane.xlu0 %149 }
  0xce   :  { %v151_v8 = vadd.f32 %v150_v7, %v125_v6 }
  0xd0   :  { %152 = vst.msk [vmem:[#allocation3] sm:$0xff] %vm51_vm0, %v151_v8 }
  0xd3   :  { %v158_v10 = vld [vmem:[#allocation2] sm:$0xff] }
  0xd4   :  { %v160_v12 = vsub.f32 %v159_v9, %v158_v10 }
  0xd6   :  { %v161_v15 = vmax.f32 %v160_v12, 0.0 }
  0xd7   :  { %v163_v13 = vld [vmem:[#allocation3] sm:$0xff] }
  0xd8   :  { %v165_v14 = vadd.f32 %v164_v11, %v163_v13 }
  0xda   :  { %v166_v16 = vmax.f32 %v165_v14, 0.0 }
  0xdc   :  { %v167_v17 = vadd.f32 %v166_v16, %v161_v15 }
  0xde   :  { %v169_v18 = vsel %vm168_vm1, %v167_v17, 0.0 }
  0xdf   :  { %170 = vst.msk [vmem:[%s312_s4] sm:$0xff] %vm51_vm0, %v169_v18 }
  0xe0   :  { %175 = vsyncpa [#allocation6], 1 }
  0xe1   :  { %176 = vsyncpa [#allocation8], 1 }

</bundles_post_ra>
